<compile_context>
chip_gen: v5e
topology: v5e:2x2
jax: 0.10.0
libtpu: 0.0.40
codegen_flags: <defaults>
</compile_context>

<pallas_src>
import jax
import jax.numpy as jnp
from jax.experimental import pallas as pl
from jax.experimental.pallas import tpu as pltpu

NUM_CLASSES = 225
IN_FEATURES = 768
LANE = 128


def linear_kernel(x_ref, w_ref, b_ref, o_ref):
    # (TM, 768) bf16 @ (768, C_pad) bf16 -> f32 accum on the MXU, f32 bias add.
    acc = jnp.dot(x_ref[...], w_ref[...], preferred_element_type=jnp.float32)
    o_ref[...] = (acc + b_ref[...]).astype(o_ref.dtype)


def custom_head_forward(x, w_pt, b, *, tm=256):
    """PyTorch-equivalent forward: x @ w_pt.T + b.

    x:    (B, 768)  float32 (cast to bf16 internally)
    w_pt: (C, 768)  float32  -- PyTorch nn.Linear weight layout
    b:    (C,)      float32
    returns (B, C) float32
    """
    B, K = x.shape
    C = w_pt.shape[0]
    assert K == IN_FEATURES

    # --- wrapper-side padding / layout (plain JAX, outside the kernel) ------
    c_pad = ((C + LANE - 1) // LANE) * LANE            # 225 -> 256 (lane-dense)
    # tile rows: multiple of 8 sublanes; pick something sane for tiny batches
    tm = max(8, min(tm, ((B + 7) // 8) * 8))
    b_pad_rows = ((B + tm - 1) // tm) * tm

    w_t = jnp.zeros((K, c_pad), jnp.bfloat16)
    w_t = w_t.at[:, :C].set(w_pt.T.astype(jnp.bfloat16))      # zero-padded cols
    bias = jnp.zeros((1, c_pad), jnp.float32)
    bias = bias.at[0, :C].set(b.astype(jnp.float32))

    x_p = jnp.zeros((b_pad_rows, K), jnp.bfloat16)
    x_p = x_p.at[:B].set(x.astype(jnp.bfloat16))

    grid = (b_pad_rows // tm,)

    out = pl.pallas_call(
        linear_kernel,
        out_shape=jax.ShapeDtypeStruct((b_pad_rows, c_pad), jnp.float32),
        grid_spec=pl.GridSpec(
            grid=grid,
            in_specs=[
                pl.BlockSpec((tm, K), lambda i: (i, 0)),        # x: tiled rows
                pl.BlockSpec((K, c_pad), lambda i: (0, 0)),     # W: VMEM-resident
                pl.BlockSpec((1, c_pad), lambda i: (0, 0)),     # bias: resident
            ],
            out_specs=pl.BlockSpec((tm, c_pad), lambda i: (i, 0)),
        ),
        compiler_params=pltpu.CompilerParams(
            dimension_semantics=("parallel",),   # shard batch tiles across TCs (v7x)
        ),
    )(x_p, w_t, bias)

    return out[:B, :C]


if __name__ == "__main__":
    key = jax.random.PRNGKey(0)
    k_x, k_w, k_b = jax.random.split(key, 3)

    B = 16   # small batch; with tm=8 below this gives a 2-step pipelined grid

    # Deterministic parameter init mimicking nn.Linear default:
    # uniform(-1/sqrt(in_features), 1/sqrt(in_features))
    bound = 1.0 / (IN_FEATURES ** 0.5)
    w_pt = jax.random.uniform(k_w, (NUM_CLASSES, IN_FEATURES),
                              minval=-bound, maxval=bound, dtype=jnp.float32)
    b = jax.random.uniform(k_b, (NUM_CLASSES,),
                           minval=-bound, maxval=bound, dtype=jnp.float32)
    x = jax.random.normal(k_x, (B, IN_FEATURES), dtype=jnp.float32)

    out = custom_head_forward(x, w_pt, b, tm=8)
    out = jax.block_until_ready(out)

    # Reference (same math as PyTorch Linear), f32. bf16 inputs => looser tol.
    ref = x @ w_pt.T + b
    assert out.shape == (B, NUM_CLASSES)
    assert jnp.allclose(out, ref, atol=5e-2, rtol=5e-2), float(
        jnp.max(jnp.abs(out - ref)))

    print("KERNEL_OK")
</pallas_src>

<mosaic_0001>
module attributes {stable_mosaic.version = 11 : i64} {
  func.func @linear_kernel(%arg0: i32, %arg1: memref<8x768xbf16, #tpu.memory_space<vmem>>, %arg2: memref<768x256xbf16, #tpu.memory_space<vmem>>, %arg3: memref<1x256xf32, #tpu.memory_space<vmem>>, %arg4: memref<8x256xf32, #tpu.memory_space<vmem>>) attributes {dimension_semantics = [#tpu.dimension_semantics<parallel>], iteration_bounds = array<i64: 2>, scalar_prefetch = 0 : i64, scratch_operands = 0 : i64, tpu.core_type = #tpu.core_type<tc>, window_params = [{transform_indices = @transform_0, window_bounds = array<i64: 8, 768>}, {pipeline_mode = #tpu.pipeline_mode<synchronous>, transform_indices = @transform_1, window_bounds = array<i64: 768, 256>}, {pipeline_mode = #tpu.pipeline_mode<synchronous>, transform_indices = @transform_2, window_bounds = array<i64: 1, 256>}, {transform_indices = @transform_3, window_bounds = array<i64: 8, 256>}]} {
    %c0 = arith.constant 0 : index
    %c0_0 = arith.constant 0 : index
    %0 = vector.load %arg1[%c0, %c0_0] : memref<8x768xbf16, #tpu.memory_space<vmem>>, vector<8x768xbf16>
    %c0_1 = arith.constant 0 : index
    %c0_2 = arith.constant 0 : index
    %1 = vector.load %arg2[%c0_1, %c0_2] : memref<768x256xbf16, #tpu.memory_space<vmem>>, vector<768x256xbf16>
    %cst = arith.constant dense<0.000000e+00> : vector<8x256xf32>
    %2 = tpu.matmul %0, %1, %cst {dimension_numbers = #tpu.dot_dimension_numbers<[1], [0], [0], [1], [0, 0, 1, 1], [], []>} : vector<8x768xbf16>, vector<768x256xbf16>, vector<8x256xf32> -> vector<8x256xf32>
    %c0_3 = arith.constant 0 : index
    %c0_4 = arith.constant 0 : index
    %3 = vector.load %arg3[%c0_3, %c0_4] : memref<1x256xf32, #tpu.memory_space<vmem>>, vector<1x256xf32>
    %4 = vector.broadcast %3 : vector<1x256xf32> to vector<8x256xf32>
    %5 = arith.addf %2, %4 : vector<8x256xf32>
    %c0_5 = arith.constant 0 : index
    %c0_6 = arith.constant 0 : index
    %6 = vector.load %arg4[%c0_5, %c0_6] : memref<8x256xf32, #tpu.memory_space<vmem>>, vector<8x256xf32>
    tpu.vector_store %arg4[%c0_5, %c0_6], %5 {strides = array<i32>} : memref<8x256xf32, #tpu.memory_space<vmem>>, vector<8x256xf32>,
    return
  }
  func.func @transform_0(%arg0: i32) -> (i32, i32) {
    %c0_i32 = arith.constant 0 : i32
    %c0_i32_0 = arith.constant 0 : i32
    return %arg0, %c0_i32 : i32, i32
  }
  func.func @transform_1(%arg0: i32) -> (i32, i32) {
    %c0_i32 = arith.constant 0 : i32
    %c0_i32_0 = arith.constant 0 : i32
    %c0_i32_1 = arith.constant 0 : i32
    return %c0_i32, %c0_i32_0 : i32, i32
  }
  func.func @transform_2(%arg0: i32) -> (i32, i32) {
    %c0_i32 = arith.constant 0 : i32
    %c0_i32_0 = arith.constant 0 : i32
    %c0_i32_1 = arith.constant 0 : i32
    return %c0_i32, %c0_i32_0 : i32, i32
  }
  func.func @transform_3(%arg0: i32) -> (i32, i32) {
    %c0_i32 = arith.constant 0 : i32
    %c0_i32_0 = arith.constant 0 : i32
    return %arg0, %c0_i32 : i32, i32
  }
}

</mosaic_0001>

<bundles_post_ra>
// kernel: tpu_custom_call.1
= control target key start
LH: loop header
LB: loop body
LE: loop exit
PB: predicated region body
PF: predicated region fallthrough
CT: control target
= control target key end

     0   :  { %8 = vsyncpa [#allocation3], 0  ;;  %s2013_s0 = inlined_call_operand.hbm [shape: bf16[16,768], index: 0, kind: input, shape index: {}]   ;;  %s2014_s1 = inlined_call_operand.hbm [shape: bf16[768,256], index: 1, kind: input, shape index: {}]   ;;  %s2015_s2 = inlined_call_operand.hbm [shape: f32[1,256], index: 2, kind: input, shape index: {}]   ;;  %s2016_s3 = inlined_call_operand.hbm [shape: f32[16,256], index: 3, kind: output, shape index: {}]  }
   0x1   :  { %10 = vsyncpa [#allocation3 + $0x1], 0 }
   0x2   :  { %11 = vsyncpa [#allocation6], 0 }
   0x3   :  { %12 = vsyncpa [#allocation4], 0 }
   0x4   :  { %14 = vsyncpa [#allocation4 + $0x1], 0  ;;  %s1844_s12 = smov 0   ;;  %s1846_s13 = smov 0  }
   0x5   :  { %s1848_s14 = smov 0   ;;  %s1850_s15 = smov 0  }
   0x6 LB: > { %s130_s18 = sshll.u32 %s2014_s1, 4  ;;  %s1868_s19 = sadd.s32 4294967295, %s1818_s15   ;;  %s1818_s15 = sphi %s1850_s15, %s2026_s15   ;;  %s1814_s14 = sphi %s1848_s14, %s2025_s14   ;;  %s1810_s13 = sphi %s1846_s13, %s2024_s13   ;;  %s1806_s12 = sphi %s1844_s12, %s2023_s12   ;;  %s131_s18 = int_to_ptr.hbm [resolvable:$true] %s130_s18 }
   0x7   : > { %p1091_p0 = scmp.ge.s32.totalorder %s1818_s15, 1  ;;  %p41_p1 = scmp.eq.s32.totalorder %s1868_s19, 0 }
   0x8   : > { %p119_p2 = scmp.lt.s32.totalorder %s1818_s15, 3  ;;  %s1820_s21 = smov [#allocation5]  }
   0x9   : > { %s132_s22 = sshll.u32 %s1820_s21, 4  ;;  %s145_s25 = sshll.u32 %s2015_s2, 4  ;;  %s133_s22 = int_to_ptr.vmem [resolvable:$true] %s132_s22  ;;  %s146_s25 = int_to_ptr.hbm [resolvable:$true] %s145_s25 }
   0xa   : > { %p1873_p3 = pnand %p1091_p0, %p119_p2  ;;  %s1821_s26 = smov [#allocation7]  }
   0xb   : > { %s147_s27 = sshll.u32 %s1821_s26, 4  ;;  %s1822_s28 = smov 128   ;;  %s148_s27 = int_to_ptr.vmem [resolvable:$true] %s147_s27 }
   0xc   : > { %p1601_p4 = pneg %p1873_p3  ;;  %s1823_s29 = smov 8  }
   0xd   : > { %s1090_s30 = sadd.s32 4294967294, %s1818_s15   ;;  %s1887_s4 = sadd.s32 1, %s1818_s15  }
   0xe   : > { %p1602_p6 = pnand %p1601_p4, %p41_p1  ;;  %s24_s5 = ssub.s32 %s1818_s15, %s1887_s4 }
   0xf   : > { %s27_s6 = sadd.s32 1, %s1814_s14  ;;  %p25_p7 = scmp.eq.s32.totalorder %s24_s5, 0 }
  0x10   : > { %1604 = dma.hbm_to_vmem [thread:$0]  (!%p1602_p6), %s131_s18, 12288, %s133_s22, [#allocation6], %s1822_s28, %s1822_s28, %s1823_s29  }
  0x11   : > { %1607 = dma.hbm_to_vmem [thread:$0]  (!%p1602_p6), %s146_s25, 32, %s148_s27, [#allocation6]  }
  0x12   : > { %p34_p8 = scmp.ne.s32.totalorder %s1814_s14, %s1810_s13  ;;  %p35_p9 = scmp.eq.s32.totalorder %s1818_s15, 0 }
  0x13   : > { %p40_p10 = scmp.ne.s32.totalorder %s1810_s13, %s1806_s12  ;;  %p106_p13 = scmp.eq.s32.totalorder %s1868_s19, 1 }
  0x14   : > { %s1898_s7 = scalar_select %p25_p7, %s1814_s14, %s27_s6  }
  0x15   : > { %p36_p11 = por %p35_p9, %p34_p8  ;;  %p1902_p12 = por %p41_p1, %p40_p10 }
  0x16   : > { %p112_p0 = scmp.eq.s32.totalorder %s1090_s30, 1  ;;  %p1618_p2 = scmp.lt.s32.totalorder %s1818_s15, 2 }
  0x17   : > { %s158_s9 = sand.u32 1, %s1814_s14   ;;  %p1909_p4 = por %p106_p13, %p34_p8 }
  0x18   : > { %p1913_p6 = por %p112_p0, %p40_p10  ;;  %s1586_s16 = smul.u32 24, %s158_s9 }
  0x19   : > { %s1587_s17 = smul.u32 24, %s1818_s15  ;;  %p1918_p7 = pnand %p1618_p2, %p36_p11 }
  0x1a   : > { %s162_s24 = scalar_lea.vmem [#allocation2], %s1586_s16  ;;  %s159_s27 = scalar_lea.sflag [#allocation3], %s158_s9 }
  0x1b   : > { %s167_s23 = scalar_lea.hbm %s2013_s0, %s1587_s17  ;;  %s171_s25 = sshll.u32 %s162_s24, 4  ;;  %s172_s25 = int_to_ptr.vmem [resolvable:$true] %s171_s25 }
  0x1c   : > { %s169_s26 = sshll.u32 %s167_s23, 4  ;;  %p1722_p9 = pneg %p1918_p7  ;;  %s170_s26 = int_to_ptr.hbm [resolvable:$true] %s169_s26 }
  0x1d   : > { %s1718_s28 = sshra.s32 %s170_s26, 4  ;;  %s1725_s6 = scalar_lea.hbm %s2013_s0, 48  ;;  %s1719_s28 = int_to_ptr.hbm [resolvable:$true] %s1718_s28 }
  0x1e   : > { %s1720_s29 = scalar_lea.hbm %s1719_s28, 24  ;;  %p1726_p13 = scmp.lt.s32.totalorder %s1719_s28, %s2013_s0 }
  0x1f   : > { %p1721_p8 = scmp.ne.s32.totalorder %s1719_s28, %s1720_s29  ;;  %p1727_p0 = scmp.lt.s32.totalorder %s1725_s6, %s1720_s29 }
  0x21   : > { %p1723_p10 = pnand %p1722_p9, %p1721_p8  ;;  %p1728_p2 = por %p1727_p0, %p1726_p13 }
  0x23   : > { %p1724_p11 = pneg %p1723_p10 }
  0x25   : > { %p1729_p5 = pnand %p1728_p2, %p1724_p11 }
  0x27   : > { %1732 = shalt.err (!%p1729_p5)
}
  0x28   : > { %1611 = dma.hbm_to_vmem [thread:$0]  (!%p1918_p7), %s170_s26, 384, %s172_s25, %s159_s27  }
  0x29   : > { %180 = sbr.rel (%p1873_p3) target bundleno = 290 (0x122), region = 32  ;;  %s1938_s9 = sand.u32 (!%p1873_p3), 1, %s1810_s13  }
  0x2a   : > { %s1588_s16 = smul.u32 (!%p1873_p3), 24, %s1938_s9  ;;  %s183_s22 = scalar_lea.sflag (!%p1873_p3), [#allocation3], %s1938_s9 }
  0x2c   : > { %s1942_s23 = scalar_lea.vmem (!%p1873_p3), [#allocation2], %s1588_s16 }
  0x2e   : > { %1793 = dma.done.wait (%p1902_p12), %s183_s22, 384  }
  0x2f   : > { %1795 = vsyncadd (%p1902_p12), %s183_s22, 4294966912 }
  0x30   : > { %1797 = dma.done.wait (%p41_p1), [#allocation6], 12320  }
  0x31   : > { %1799 = vsyncadd (%p41_p1), [#allocation6], 4294954976  ;;  %v1158_v0 = vld [vmem:[#allocation5 + $0x70] sm:$0xf]  ;;  %v1504_v1 = vld [vmem:[#allocation5 + $0x74] sm:$0xf0] }
  0x32   : > { %v1222_v2 = vld [vmem:[#allocation5 + $0xf0] sm:$0xf]  ;;  %v1159_v3 = vor.u32 %v1504_v1, %v1158_v0  ;;  %v1520_v4 = vld [vmem:[#allocation5 + $0xf4] sm:$0xf0]  ;;  %v1150_v11 = vld [vmem:[#allocation5 + $0x60] sm:$0xf] }
  0x33   : > { %v1286_v5 = vld [vmem:[#allocation5 + $0x170] sm:$0xf]  ;;  %v1536_v6 = vld [vmem:[#allocation5 + $0x174] sm:$0xf0]  ;;  %v1223_v7 = vor.u32 %v1520_v4, %v1222_v2  ;;  %v1502_v13 = vld [vmem:[#allocation5 + $0x64] sm:$0xf0] }
  0x34   : > { %v1287_v8 = vor.u32 %v1536_v6, %v1286_v5  ;;  %v1350_v9 = vld [vmem:[#allocation5 + $0x1f0] sm:$0xf]  ;;  %v1552_v10 = vld [vmem:[#allocation5 + $0x1f4] sm:$0xf0]  ;;  %826 = vmatpush.bf16.msra.mxu0 %v1159_v3  ;;  %v1214_v14 = vld [vmem:[#allocation5 + $0xe0] sm:$0xf]  ;;  %v1151_v16 = vor.u32 %v1502_v13, %v1150_v11 }
  0x35   : > { %v1351_v12 = vor.u32 %v1552_v10, %v1350_v9  ;;  %v1518_v15 = vld [vmem:[#allocation5 + $0xe4] sm:$0xf0]  ;;  %839 = vmatpush.bf16.msra.mxu1 %v1223_v7  ;;  %v1278_v18 = vld [vmem:[#allocation5 + $0x160] sm:$0xf]  ;;  %v1142_v23 = vld [vmem:[#allocation5 + $0x50] sm:$0xf] }
  0x36   : > { %852 = vmatpush.bf16.msra.mxu2 %v1287_v8  ;;  %v1215_v17 = vor.u32 %v1518_v15, %v1214_v14  ;;  %v1534_v19 = vld [vmem:[#allocation5 + $0x164] sm:$0xf0]  ;;  %v1342_v20 = vld [vmem:[#allocation5 + $0x1e0] sm:$0xf]  ;;  %v1500_v24 = vld [vmem:[#allocation5 + $0x54] sm:$0xf0] }
  0x37   : > { %865 = vmatpush.bf16.msra.mxu3 %v1351_v12  ;;  %v1279_v21 = vor.u32 %v1534_v19, %v1278_v18  ;;  %v1550_v22 = vld [vmem:[#allocation5 + $0x1e4] sm:$0xf0]  ;;  %v1206_v26 = vld [vmem:[#allocation5 + $0xd0] sm:$0xf]  ;;  %v1516_v27 = vld [vmem:[#allocation5 + $0xd4] sm:$0xf0]  ;;  %v1143_v29 = vor.u32 %v1500_v24, %v1142_v23 }
  0x38   : > { %v1343_v25 = vor.u32 %v1550_v22, %v1342_v20  ;;  %v1270_v28 = vld [vmem:[#allocation5 + $0x150] sm:$0xf]  ;;  %827 = vmatpush.bf16.msra.mxu0 %v1151_v16  ;;  %v1532_v30 = vld [vmem:[#allocation5 + $0x154] sm:$0xf0]  ;;  %v1207_v33 = vor.u32 %v1516_v27, %v1206_v26  ;;  %v1134_v35 = vld [vmem:[#allocation5 + $0x40] sm:$0xf] }
  0x39   : > { %v1334_v31 = vld [vmem:[#allocation5 + $0x1d0] sm:$0xf]  ;;  %v1548_v32 = vld [vmem:[#allocation5 + $0x1d4] sm:$0xf0]  ;;  %840 = vmatpush.bf16.msra.mxu1 %v1215_v17  ;;  %v1271_v34 = vor.u32 %v1532_v30, %v1270_v28  ;;  %v1498_v36 = vld [vmem:[#allocation5 + $0x44] sm:$0xf0] }
  0x3a   : > { %853 = vmatpush.bf16.msra.mxu2 %v1279_v21  ;;  %v1198_v37 = vld [vmem:[#allocation5 + $0xc0] sm:$0xf]  ;;  %v1335_v38 = vor.u32 %v1548_v32, %v1334_v31  ;;  %v1514_v39 = vld [vmem:[#allocation5 + $0xc4] sm:$0xf0]  ;;  %v1135_v44 = vor.u32 %v1498_v36, %v1134_v35  ;;  %v1126_v47 = vld [vmem:[#allocation5 + $0x30] sm:$0xf] }
  0x3b   : > { %866 = vmatpush.bf16.msra.mxu3 %v1343_v25  ;;  %v1262_v40 = vld [vmem:[#allocation5 + $0x140] sm:$0xf]  ;;  %v1530_v41 = vld [vmem:[#allocation5 + $0x144] sm:$0xf0]  ;;  %v1199_v45 = vor.u32 %v1514_v39, %v1198_v37  ;;  %v1496_v48 = vld [vmem:[#allocation5 + $0x34] sm:$0xf0] }
  0x3c   : > { %v1326_v42 = vld [vmem:[#allocation5 + $0x1c0] sm:$0xf]  ;;  %v1546_v43 = vld [vmem:[#allocation5 + $0x1c4] sm:$0xf0]  ;;  %828 = vmatpush.bf16.msra.mxu0 %v1143_v29  ;;  %v1263_v46 = vor.u32 %v1530_v41, %v1262_v40  ;;  %v1190_v49 = vld [vmem:[#allocation5 + $0xb0] sm:$0xf]  ;;  %v1127_v56 = vor.u32 %v1496_v48, %v1126_v47 }
  0x3d   : > { %841 = vmatpush.bf16.msra.mxu1 %v1207_v33  ;;  %v1327_v50 = vor.u32 %v1546_v43, %v1326_v42  ;;  %v1512_v51 = vld [vmem:[#allocation5 + $0xb4] sm:$0xf0]  ;;  %v1254_v52 = vld [vmem:[#allocation5 + $0x130] sm:$0xf]  ;;  %v1118_v59 = vld [vmem:[#allocation5 + $0x20] sm:$0xf] }
  0x3e   : > { %854 = vmatpush.bf16.msra.mxu2 %v1271_v34  ;;  %v1528_v53 = vld [vmem:[#allocation5 + $0x134] sm:$0xf0]  ;;  %v1318_v54 = vld [vmem:[#allocation5 + $0x1b0] sm:$0xf]  ;;  %v1191_v57 = vor.u32 %v1512_v51, %v1190_v49  ;;  %v1494_v60 = vld [vmem:[#allocation5 + $0x24] sm:$0xf0] }
  0x3f   : > { %867 = vmatpush.bf16.msra.mxu3 %v1335_v38  ;;  %v1544_v55 = vld [vmem:[#allocation5 + $0x1b4] sm:$0xf0]  ;;  %v1255_v58 = vor.u32 %v1528_v53, %v1254_v52  ;;  %v1182_v61 = vld [vmem:[#allocation5 + $0xa0] sm:$0xf]  ;;  %v1510_v63 = vld [vmem:[#allocation5 + $0xa4] sm:$0xf0]  ;;  %v1119_v4 = vor.u32 %v1494_v60, %v1118_v59 }
  0x40   : > { %829 = vmatpush.bf16.msra.mxu0 %v1135_v44  ;;  %v1319_v62 = vor.u32 %v1544_v55, %v1318_v54  ;;  %v1246_v0 = vld [vmem:[#allocation5 + $0x120] sm:$0xf]  ;;  %v1526_v1 = vld [vmem:[#allocation5 + $0x124] sm:$0xf0]  ;;  %v1183_v5 = vor.u32 %v1510_v63, %v1182_v61  ;;  %v1110_v7 = vld [vmem:[#allocation5 + $0x10] sm:$0xf] }
  0x41   : > { %842 = vmatpush.bf16.msra.mxu1 %v1199_v45  ;;  %v1310_v2 = vld [vmem:[#allocation5 + $0x1a0] sm:$0xf]  ;;  %v1542_v3 = vld [vmem:[#allocation5 + $0x1a4] sm:$0xf0]  ;;  %v1247_v6 = vor.u32 %v1526_v1, %v1246_v0  ;;  %v1492_v8 = vld [vmem:[#allocation5 + $0x14] sm:$0xf0] }
  0x42   : > { %855 = vmatpush.bf16.msra.mxu2 %v1263_v46  ;;  %v1174_v9 = vld [vmem:[#allocation5 + $0x90] sm:$0xf]  ;;  %v1311_v10 = vor.u32 %v1542_v3, %v1310_v2  ;;  %v1508_v11 = vld [vmem:[#allocation5 + $0x94] sm:$0xf0]  ;;  %v1111_v16 = vor.u32 %v1492_v8, %v1110_v7  ;;  %v1102_v17 = vld [vmem:[#allocation5] sm:$0xf] }
  0x43   : > { %868 = vmatpush.bf16.msra.mxu3 %v1327_v50  ;;  %v1238_v12 = vld [vmem:[#allocation5 + $0x110] sm:$0xf]  ;;  %v1524_v13 = vld [vmem:[#allocation5 + $0x114] sm:$0xf0]  ;;  %v1490_v18 = vld [vmem:[#allocation5 + $0x4] sm:$0xf0]  ;;  %v1175_v19 = vor.u32 %v1508_v11, %v1174_v9 }
  0x44   : > { %830 = vmatpush.bf16.msra.mxu0 %v1127_v56  ;;  %v1302_v14 = vld [vmem:[#allocation5 + $0x190] sm:$0xf]  ;;  %v1540_v15 = vld [vmem:[#allocation5 + $0x194] sm:$0xf0]  ;;  %v1239_v20 = vor.u32 %v1524_v13, %v1238_v12  ;;  %v1166_v21 = vld [vmem:[#allocation5 + $0x80] sm:$0xf]  ;;  %v1103_v31 = vor.u32 %v1490_v18, %v1102_v17 }
  0x45   : > { %843 = vmatpush.bf16.msra.mxu1 %v1191_v57  ;;  %v1506_v22 = vld [vmem:[#allocation5 + $0x84] sm:$0xf0]  ;;  %v1230_v23 = vld [vmem:[#allocation5 + $0x100] sm:$0xf]  ;;  %v1303_v24 = vor.u32 %v1540_v15, %v1302_v14  ;;  %v1414_v28 = vld [vmem:[#allocation5 + $0x270] sm:$0xf] }
  0x46   : > { %856 = vmatpush.bf16.msra.mxu2 %v1255_v58  ;;  %v1522_v25 = vld [vmem:[#allocation5 + $0x104] sm:$0xf0]  ;;  %v1294_v26 = vld [vmem:[#allocation5 + $0x180] sm:$0xf]  ;;  %v1568_v29 = vld [vmem:[#allocation5 + $0x274] sm:$0xf0]  ;;  %v1167_v35 = vor.u32 %v1506_v22, %v1166_v21 }
  0x47   : > { %869 = vmatpush.bf16.msra.mxu3 %v1319_v62  ;;  %v1538_v27 = vld [vmem:[#allocation5 + $0x184] sm:$0xf0]  ;;  %v1478_v30 = vld [vmem:[#allocation5 + $0x2f0] sm:$0xf]  ;;  %v1584_v32 = vld [vmem:[#allocation5 + $0x2f4] sm:$0xf0]  ;;  %v1231_v36 = vor.u32 %v1522_v25, %v1230_v23  ;;  %v1415_v40 = vor.u32 %v1568_v29, %v1414_v28 }
  0x48   : > { %831 = vmatpush.bf16.msra.mxu0 %v1119_v4  ;;  %v1503_v33 = vld [vmem:[#allocation5 + $0x74] sm:$0xf]  ;;  %v1160_v34 = vld [vmem:[#allocation5 + $0x78] sm:$0xf0]  ;;  %v1295_v39 = vor.u32 %v1538_v27, %v1294_v26  ;;  %v1479_v41 = vor.u32 %v1584_v32, %v1478_v30  ;;  %v1406_v43 = vld [vmem:[#allocation5 + $0x260] sm:$0xf] }
  0x49   : > { %844 = vmatpush.bf16.msra.mxu1 %v1183_v5  ;;  %v1519_v37 = vld [vmem:[#allocation5 + $0xf4] sm:$0xf]  ;;  %v1224_v38 = vld [vmem:[#allocation5 + $0xf8] sm:$0xf0]  ;;  %v1163_v42 = vor.u32 %v1503_v33, %v1160_v34  ;;  %v1566_v44 = vld [vmem:[#allocation5 + $0x264] sm:$0xf0] }
  0x4a   : > { %857 = vmatpush.bf16.msra.mxu2 %v1247_v6  ;;  %v1470_v45 = vld [vmem:[#allocation5 + $0x2e0] sm:$0xf]  ;;  %v1227_v46 = vor.u32 %v1519_v37, %v1224_v38  ;;  %v1582_v47 = vld [vmem:[#allocation5 + $0x2e4] sm:$0xf0]  ;;  %v1501_v48 = vld [vmem:[#allocation5 + $0x64] sm:$0xf]  ;;  %v1407_v52 = vor.u32 %v1566_v44, %v1406_v43 }
  0x4b   : > { %870 = vmatpush.bf16.msra.mxu3 %v1311_v10  ;;  %v1152_v49 = vld [vmem:[#allocation5 + $0x68] sm:$0xf0]  ;;  %v1517_v50 = vld [vmem:[#allocation5 + $0xe4] sm:$0xf]  ;;  %v1398_v53 = vld [vmem:[#allocation5 + $0x250] sm:$0xf]  ;;  %v1471_v55 = vor.u32 %v1582_v47, %v1470_v45 }
  0x4c   : > { %832 = vmatpush.bf16.msra.mxu0 %v1111_v16  ;;  %v1216_v51 = vld [vmem:[#allocation5 + $0xe8] sm:$0xf0]  ;;  %v1564_v54 = vld [vmem:[#allocation5 + $0x254] sm:$0xf0]  ;;  %v1155_v56 = vor.u32 %v1501_v48, %v1152_v49  ;;  %v1462_v57 = vld [vmem:[#allocation5 + $0x2d0] sm:$0xf] }
  0x4d   : > { %845 = vmatpush.bf16.msra.mxu1 %v1175_v19  ;;  %v1580_v58 = vld [vmem:[#allocation5 + $0x2d4] sm:$0xf0]  ;;  %v220_v59 = vld [vmem:[%s1942_s23] sm:$0xff]  ;;  %v1219_v60 = vor.u32 %v1517_v50, %v1216_v51  ;;  %v1144_v62 = vld [vmem:[#allocation5 + $0x58] sm:$0xf0]  ;;  %v1399_v6 = vor.u32 %v1564_v54, %v1398_v53  ;;  %s1099_s20 = sshll.u32 %s1938_s9, 4 }
  0x4e   : > { %858 = vmatpush.bf16.msra.mxu2 %v1239_v20  ;;  %v1499_v61 = vld [vmem:[#allocation5 + $0x54] sm:$0xf]  ;;  %v328_v63 = vunpack.c.l.b16 %v220_v59  ;;  %v329_v1 = vunpack.c.h.b16 %v220_v59  ;;  %v1208_v3 = vld [vmem:[#allocation5 + $0xd8] sm:$0xf0]  ;;  %v1463_v7 = vor.u32 %v1580_v58, %v1462_v57  ;;  %v1390_v11 = vld [vmem:[#allocation5 + $0x240] sm:$0xf] }
  0x4f   : > { %871 = vmatpush.bf16.msra.mxu3 %v1303_v24  ;;  %v221_v0 = vld [vmem:[%s1942_s23 + $0x8] sm:$0xff]  ;;  %v1147_v10 = vor.u32 %v1499_v61, %v1144_v62  ;;  %v1562_v12 = vld [vmem:[#allocation5 + $0x244] sm:$0xf0]  ;;  %v1454_v13 = vld [vmem:[#allocation5 + $0x2c0] sm:$0xf]  ;;  %s219_s8 = scalar_lea.vmem [#allocation8], %s1099_s20 }
  0x50   : > { %833 = vmatpush.bf16.msra.mxu0 %v1103_v31  ;;  %v1515_v2 = vld [vmem:[#allocation5 + $0xd4] sm:$0xf]  ;;  %v330_v4 = vunpack.c.l.b16 %v221_v0  ;;  %v331_v5 = vunpack.c.h.b16 %v221_v0  ;;  %v1954_v8 = vpack.c.b16 %v328_v63, %v328_v63  ;;  %v1956_v9 = vpack.c.b16 %v329_v1, %v329_v1  ;;  %v1578_v17 = vld [vmem:[#allocation5 + $0x2c4] sm:$0xf0]  ;;  %v1497_v18 = vld [vmem:[#allocation5 + $0x44] sm:$0xf] }
  0x51   : > { %846 = vmatpush.bf16.msra.mxu1 %v1167_v35  ;;  %v1211_v16 = vor.u32 %v1515_v2, %v1208_v3  ;;  %v1136_v19 = vld [vmem:[#allocation5 + $0x48] sm:$0xf0]  ;;  %v1513_v20 = vld [vmem:[#allocation5 + $0xc4] sm:$0xf]  ;;  %v1391_v22 = vor.u32 %v1562_v12, %v1390_v11  ;;  %v1455_v23 = vor.u32 %v1578_v17, %v1454_v13  ;;  %v1382_v25 = vld [vmem:[#allocation5 + $0x230] sm:$0xf] }
  0x52   : > { %859 = vmatpush.bf16.msra.mxu2 %v1231_v36  ;;  %v1958_v14 = vpack.c.b16 %v330_v4, %v330_v4  ;;  %v1960_v15 = vpack.c.b16 %v331_v5, %v331_v5  ;;  %v1200_v21 = vld [vmem:[#allocation5 + $0xc8] sm:$0xf0]  ;;  %v1139_v24 = vor.u32 %v1497_v18, %v1136_v19  ;;  %v1560_v26 = vld [vmem:[#allocation5 + $0x234] sm:$0xf0]  ;;  %v1446_v27 = vld [vmem:[#allocation5 + $0x2b0] sm:$0xf] }
  0x53   : > { %872 = vmatpush.bf16.msra.mxu3 %v1295_v39  ;;  %834 = vmatmul.bf16.vlgmr.msra.gmra.mxu0 %v1954_v8  ;;  %v1203_v28 = vor.u32 %v1513_v20, %v1200_v21  ;;  %v1576_v29 = vld [vmem:[#allocation5 + $0x2b4] sm:$0xf0]  ;;  %v1495_v30 = vld [vmem:[#allocation5 + $0x34] sm:$0xf]  ;;  %v1128_v31 = vld [vmem:[#allocation5 + $0x38] sm:$0xf0]  ;;  %v1383_v34 = vor.u32 %v1560_v26, %v1382_v25 }
  0x54   : > { %878 = vmatpush.bf16.msrb.mxu0 %v1415_v40  ;;  %847 = vmatmul.bf16.vlgmr.msra.gmra.mxu1 %v1956_v9  ;;  %v1511_v32 = vld [vmem:[#allocation5 + $0xb4] sm:$0xf]  ;;  %v1192_v33 = vld [vmem:[#allocation5 + $0xb8] sm:$0xf0]  ;;  %v1447_v35 = vor.u32 %v1576_v29, %v1446_v27  ;;  %v1131_v36 = vor.u32 %v1495_v30, %v1128_v31  ;;  %v1374_v37 = vld [vmem:[#allocation5 + $0x220] sm:$0xf] }
  0x55   : > { %891 = vmatpush.bf16.msrb.mxu1 %v1479_v41  ;;  %860 = vmatmul.bf16.vlgmr.msra.gmra.mxu2 %v1958_v14  ;;  %v1558_v38 = vld [vmem:[#allocation5 + $0x224] sm:$0xf0]  ;;  %v1438_v39 = vld [vmem:[#allocation5 + $0x2a0] sm:$0xf]  ;;  %v1195_v40 = vor.u32 %v1511_v32, %v1192_v33  ;;  %v1120_v43 = vld [vmem:[#allocation5 + $0x28] sm:$0xf0] }
  0x56   : > { %904 = vmatpush.bf16.msrb.mxu2 %v1163_v42  ;;  %873 = vmatmul.bf16.vlgmr.msra.gmra.mxu3 %v1960_v15  ;;  %v1574_v41 = vld [vmem:[#allocation5 + $0x2a4] sm:$0xf0]  ;;  %v1493_v42 = vld [vmem:[#allocation5 + $0x24] sm:$0xf]  ;;  %v1184_v45 = vld [vmem:[#allocation5 + $0xa8] sm:$0xf0] }
  0x57   : > { %917 = vmatpush.bf16.msrb.mxu3 %v1227_v46  ;;  %v1509_v44 = vld [vmem:[#allocation5 + $0xa4] sm:$0xf]  ;;  %v1375_v46 = vor.u32 %v1558_v38, %v1374_v37  ;;  %v1439_v47 = vor.u32 %v1574_v41, %v1438_v39  ;;  %v1123_v48 = vor.u32 %v1493_v42, %v1120_v43  ;;  %v1366_v49 = vld [vmem:[#allocation5 + $0x210] sm:$0xf]  ;;  %v1556_v50 = vld [vmem:[#allocation5 + $0x214] sm:$0xf0] }
  0x58   : > { %879 = vmatpush.bf16.msrb.mxu0 %v1407_v52  ;;  %v1430_v51 = vld [vmem:[#allocation5 + $0x290] sm:$0xf]  ;;  %v1187_v52 = vor.u32 %v1509_v44, %v1184_v45  ;;  %v1572_v53 = vld [vmem:[#allocation5 + $0x294] sm:$0xf0]  ;;  %v1491_v54 = vld [vmem:[#allocation5 + $0x14] sm:$0xf]  ;;  %v1367_v58 = vor.u32 %v1556_v50, %v1366_v49 }
  0x59   : > { %892 = vmatpush.bf16.msrb.mxu1 %v1471_v55  ;;  %v1112_v55 = vld [vmem:[#allocation5 + $0x18] sm:$0xf0]  ;;  %v1358_v59 = vld [vmem:[#allocation5 + $0x200] sm:$0xf]  ;;  %v1431_v62 = vor.u32 %v1572_v53, %v1430_v51  ;;  %v1570_v0 = vld [vmem:[#allocation5 + $0x284] sm:$0xf0] }
  0x5a   : > { %905 = vmatpush.bf16.msrb.mxu2 %v1155_v56  ;;  %v1507_v56 = vld [vmem:[#allocation5 + $0x94] sm:$0xf]  ;;  %v1176_v57 = vld [vmem:[#allocation5 + $0x98] sm:$0xf0]  ;;  %v1422_v61 = vld [vmem:[#allocation5 + $0x280] sm:$0xf]  ;;  %v1115_v63 = vor.u32 %v1491_v54, %v1112_v55 }
  0x5b   : > { %918 = vmatpush.bf16.msrb.mxu3 %v1219_v60  ;;  %v1554_v60 = vld [vmem:[#allocation5 + $0x204] sm:$0xf0]  ;;  %v1489_v1 = vld [vmem:[#allocation5 + $0x4] sm:$0xf]  ;;  %v1179_v3 = vor.u32 %v1507_v56, %v1176_v57  ;;  %v1104_v4 = vld [vmem:[#allocation5 + $0x8] sm:$0xf0]  ;;  %v1423_v19 = vor.u32 %v1570_v0, %v1422_v61 }
  0x5c   : > { %880 = vmatpush.bf16.msrb.mxu0 %v1399_v6  ;;  %v222_v2 = vld [vmem:[%s1942_s23 + $0x10] sm:$0xff]  ;;  %v1168_v6 = vld [vmem:[#allocation5 + $0x88] sm:$0xf0]  ;;  %v1551_v11 = vld [vmem:[#allocation5 + $0x1f4] sm:$0xf]  ;;  %v1359_v12 = vor.u32 %v1554_v60, %v1358_v59  ;;  %v1107_v20 = vor.u32 %v1489_v1, %v1104_v4  ;;  %s1585_s18 = sshll.u32 %s1868_s19, 4 }
  0x5d   : > { %893 = vmatpush.bf16.msrb.mxu1 %v1463_v7  ;;  %v1505_v5 = vld [vmem:[#allocation5 + $0x84] sm:$0xf]  ;;  %v1535_v7 = vld [vmem:[#allocation5 + $0x174] sm:$0xf]  ;;  %v1352_v13 = vld [vmem:[#allocation5 + $0x1f8] sm:$0xf0]  ;;  %v332_v18 = vunpack.c.l.b16 %v222_v2  ;;  %v333_v25 = vunpack.c.h.b16 %v222_v2  ;;  %s996_s26 = scalar_lea.hbm %s2016_s3, %s1585_s18 }
  0x5e   : > { %906 = vmatpush.bf16.msrb.mxu2 %v1147_v10  ;;  %v1288_v10 = vld [vmem:[#allocation5 + $0x178] sm:$0xf0]  ;;  %v1583_v21 = vld [vmem:[#allocation5 + $0x2f4] sm:$0xf]  ;;  %v1355_v26 = vor.u32 %v1551_v11, %v1352_v13  ;;  %v1280_v29 = vld [vmem:[#allocation5 + $0x168] sm:$0xf0] }
  0x5f   : > { %919 = vmatpush.bf16.msrb.mxu3 %v1211_v16  ;;  %v1567_v16 = vld [vmem:[#allocation5 + $0x274] sm:$0xf]  ;;  %v1416_v17 = vld [vmem:[#allocation5 + $0x278] sm:$0xf0]  ;;  %v1549_v30 = vld [vmem:[#allocation5 + $0x1e4] sm:$0xf]  ;;  %v1969_v39 = vpack.c.b16 %v333_v25, %v333_v25 }
  0x60   : > { %881 = vmatpush.bf16.msrb.mxu0 %v1391_v22  ;;  %v1480_v22 = vld [vmem:[#allocation5 + $0x2f8] sm:$0xf0]  ;;  %v1419_v27 = vor.u32 %v1567_v16, %v1416_v17  ;;  %v1344_v32 = vld [vmem:[#allocation5 + $0x1e8] sm:$0xf0]  ;;  %v1565_v33 = vld [vmem:[#allocation5 + $0x264] sm:$0xf] }
  0x61   : > { %894 = vmatpush.bf16.msrb.mxu1 %v1455_v23  ;;  %v1171_v23 = vor.u32 %v1505_v5, %v1168_v6  ;;  %v1483_v31 = vor.u32 %v1583_v21, %v1480_v22  ;;  %v1472_v37 = vld [vmem:[#allocation5 + $0x2e8] sm:$0xf0]  ;;  %v1531_v42 = vld [vmem:[#allocation5 + $0x154] sm:$0xf]  ;;  %v1272_v43 = vld [vmem:[#allocation5 + $0x158] sm:$0xf0] }
  0x62   : > { %907 = vmatpush.bf16.msrb.mxu2 %v1139_v24  ;;  %v1291_v24 = vor.u32 %v1535_v7, %v1288_v10  ;;  %v1547_v44 = vld [vmem:[#allocation5 + $0x1d4] sm:$0xf]  ;;  %v1464_v50 = vld [vmem:[#allocation5 + $0x2d8] sm:$0xf0]  ;;  %v1275_v51 = vor.u32 %v1531_v42, %v1272_v43  ;;  %v1529_v54 = vld [vmem:[#allocation5 + $0x144] sm:$0xf] }
  0x63   : > { %920 = vmatpush.bf16.msrb.mxu3 %v1203_v28  ;;  %v1533_v28 = vld [vmem:[#allocation5 + $0x164] sm:$0xf]  ;;  %v1579_v49 = vld [vmem:[#allocation5 + $0x2d4] sm:$0xf]  ;;  %v1264_v55 = vld [vmem:[#allocation5 + $0x148] sm:$0xf0] }
  0x64   : > { %882 = vmatpush.bf16.msrb.mxu0 %v1383_v34  ;;  %v1408_v34 = vld [vmem:[#allocation5 + $0x268] sm:$0xf0]  ;;  %v1283_v38 = vor.u32 %v1533_v28, %v1280_v29  ;;  %v1545_v56 = vld [vmem:[#allocation5 + $0x1c4] sm:$0xf]  ;;  %v1467_v57 = vor.u32 %v1579_v49, %v1464_v50  ;;  %v1267_v61 = vor.u32 %v1529_v54, %v1264_v55  ;;  %v1527_v0 = vld [vmem:[#allocation5 + $0x134] sm:$0xf] }
  0x65   : > { %895 = vmatpush.bf16.msrb.mxu1 %v1447_v35  ;;  %v1967_v35 = vpack.c.b16 %v332_v18, %v332_v18  ;;  %v1411_v41 = vor.u32 %v1565_v33, %v1408_v34  ;;  %v1561_v59 = vld [vmem:[#allocation5 + $0x244] sm:$0xf]  ;;  %v1256_v1 = vld [vmem:[#allocation5 + $0x138] sm:$0xf0]  ;;  %v1543_v2 = vld [vmem:[#allocation5 + $0x1b4] sm:$0xf] }
  0x66   : > { %908 = vmatpush.bf16.msrb.mxu2 %v1131_v36  ;;  %v1581_v36 = vld [vmem:[#allocation5 + $0x2e4] sm:$0xf]  ;;  %v1320_v4 = vld [vmem:[#allocation5 + $0x1b8] sm:$0xf0]  ;;  %v1559_v5 = vld [vmem:[#allocation5 + $0x234] sm:$0xf]  ;;  %v1259_v11 = vor.u32 %v1527_v0, %v1256_v1 }
  0x67   : > { %921 = vmatpush.bf16.msrb.mxu3 %v1195_v40  ;;  %v1347_v40 = vor.u32 %v1549_v30, %v1344_v32  ;;  %v1475_v45 = vor.u32 %v1581_v36, %v1472_v37  ;;  %v1577_v60 = vld [vmem:[#allocation5 + $0x2c4] sm:$0xf]  ;;  %v1384_v6 = vld [vmem:[#allocation5 + $0x238] sm:$0xf0]  ;;  %v1575_v7 = vld [vmem:[#allocation5 + $0x2b4] sm:$0xf] }
  0x68   : > { %883 = vmatpush.bf16.msrb.mxu0 %v1375_v46  ;;  %v1336_v46 = vld [vmem:[#allocation5 + $0x1d8] sm:$0xf0]  ;;  %v1387_v13 = vor.u32 %v1559_v5, %v1384_v6  ;;  %v1525_v16 = vld [vmem:[#allocation5 + $0x124] sm:$0xf]  ;;  %v1248_v17 = vld [vmem:[#allocation5 + $0x128] sm:$0xf0] }
  0x69   : > { %896 = vmatpush.bf16.msrb.mxu1 %v1439_v47  ;;  %v1563_v47 = vld [vmem:[#allocation5 + $0x254] sm:$0xf]  ;;  %v1448_v10 = vld [vmem:[#allocation5 + $0x2b8] sm:$0xf0]  ;;  %v1541_v18 = vld [vmem:[#allocation5 + $0x1a4] sm:$0xf]  ;;  %v1251_v25 = vor.u32 %v1525_v16, %v1248_v17 }
  0x6a   : > { %909 = vmatpush.bf16.msrb.mxu2 %v1123_v48  ;;  %v1400_v48 = vld [vmem:[#allocation5 + $0x258] sm:$0xf0]  ;;  %v1557_v21 = vld [vmem:[#allocation5 + $0x224] sm:$0xf]  ;;  %v1376_v22 = vld [vmem:[#allocation5 + $0x228] sm:$0xf0] }
  0x6b   : > { %922 = vmatpush.bf16.msrb.mxu3 %v1187_v52  ;;  %v1339_v52 = vor.u32 %v1547_v44, %v1336_v46  ;;  %v1403_v53 = vor.u32 %v1563_v47, %v1400_v48  ;;  %v1523_v28 = vld [vmem:[#allocation5 + $0x114] sm:$0xf]  ;;  %v1240_v29 = vld [vmem:[#allocation5 + $0x118] sm:$0xf0]  ;;  %v1521_v42 = vld [vmem:[#allocation5 + $0x104] sm:$0xf] }
  0x6c   : > { %884 = vmatpush.bf16.msrb.mxu0 %v1367_v58  ;;  %v1328_v58 = vld [vmem:[#allocation5 + $0x1c8] sm:$0xf0]  ;;  %v1539_v30 = vld [vmem:[#allocation5 + $0x194] sm:$0xf]  ;;  %v1304_v32 = vld [vmem:[#allocation5 + $0x198] sm:$0xf0] }
  0x6d   : > { %897 = vmatpush.bf16.msrb.mxu1 %v1431_v62  ;;  %v1331_v62 = vor.u32 %v1545_v56, %v1328_v58  ;;  %v1555_v33 = vld [vmem:[#allocation5 + $0x214] sm:$0xf]  ;;  %v1368_v34 = vld [vmem:[#allocation5 + $0x218] sm:$0xf0]  ;;  %v1232_v43 = vld [vmem:[#allocation5 + $0x108] sm:$0xf0] }
  0x6e   : > { %910 = vmatpush.bf16.msrb.mxu2 %v1115_v63  ;;  %v1571_v36 = vld [vmem:[#allocation5 + $0x294] sm:$0xf]  ;;  %v1432_v37 = vld [vmem:[#allocation5 + $0x298] sm:$0xf0]  ;;  %v1537_v44 = vld [vmem:[#allocation5 + $0x184] sm:$0xf] }
  0x6f   : > { %923 = vmatpush.bf16.msrb.mxu3 %v1179_v3  ;;  %v1296_v46 = vld [vmem:[#allocation5 + $0x188] sm:$0xf0]  ;;  %v1553_v47 = vld [vmem:[#allocation5 + $0x204] sm:$0xf]  ;;  %s998_s27 = sshll.u32 %s219_s8, 4  ;;  %s1000_s28 = sshll.u32 %s996_s26, 4  ;;  %s999_s27 = int_to_ptr.vmem [resolvable:$true] %s998_s27  ;;  %s1001_s28 = int_to_ptr.hbm [resolvable:$true] %s1000_s28 }
  0x70   : > { %885 = vmatpush.bf16.msrb.mxu0 %v1359_v12  ;;  %v1323_v12 = vor.u32 %v1543_v2, %v1320_v4  ;;  %v1360_v48 = vld [vmem:[#allocation5 + $0x208] sm:$0xf0]  ;;  %v1569_v49 = vld [vmem:[#allocation5 + $0x284] sm:$0xf]  ;;  %s985_s29 = scalar_lea.sflag [#allocation4], %s1938_s9  ;;  %s1762_s19 = sshra.s32 %s1001_s28, 4  ;;  %s1763_s19 = int_to_ptr.hbm [resolvable:$true] %s1762_s19 }
  0x71   : > { %898 = vmatpush.bf16.msrb.mxu1 %v1423_v19  ;;  %v1451_v19 = vor.u32 %v1575_v7, %v1448_v10  ;;  %v1424_v50 = vld [vmem:[#allocation5 + $0x288] sm:$0xf0]  ;;  %s1764_s30 = scalar_lea.hbm %s1763_s19, 16  ;;  %s1768_s21 = scalar_lea.hbm %s2016_s3, 32 }
  0x72   : > { %911 = vmatpush.bf16.msrb.mxu2 %v1107_v20  ;;  %v1312_v20 = vld [vmem:[#allocation5 + $0x1a8] sm:$0xf0]  ;;  %v1427_v54 = vor.u32 %v1569_v49, %v1424_v50  ;;  %p1765_p1 = scmp.ne.s32.totalorder %s1763_s19, %s1764_s30  ;;  %p1769_p12 = scmp.lt.s32.totalorder %s1763_s19, %s2016_s3 }
  0x73   : > { %924 = vmatpush.bf16.msrb.mxu3 %v1171_v23  ;;  %886 = vmatmul.bf16.vlgmr.msrb.gmra.mxu0 %v1967_v35  ;;  %v1573_v23 = vld [vmem:[#allocation5 + $0x2a4] sm:$0xf]  ;;  %p1770_p7 = scmp.lt.s32.totalorder %s1768_s21, %s1764_s30 }
  0x74   : > { %930 = vmatpush.bf16.msra.mxu0 %v1291_v24  ;;  %899 = vmatmul.bf16.vlgmr.msrb.gmra.mxu1 %v1969_v39  ;;  %v1440_v24 = vld [vmem:[#allocation5 + $0x2a8] sm:$0xf0]  ;;  %p1766_p3 = pnand %p1765_p1, %p1909_p4 }
  0x75   : > { %943 = vmatpush.bf16.msra.mxu1 %v1355_v26  ;;  %912 = vmatmul.bf16.vlgmr.msrb.gmra.mxu2 %v1954_v8  ;;  %v1392_v8 = vld [vmem:[#allocation5 + $0x248] sm:$0xf0]  ;;  %v1315_v26 = vor.u32 %v1541_v18, %v1312_v20  ;;  %p1771_p8 = por %p1770_p7, %p1769_p12 }
  0x76   : > { %956 = vmatpush.bf16.msra.mxu2 %v1419_v27  ;;  %925 = vmatmul.bf16.vlgmr.msrb.gmra.mxu3 %v1956_v9  ;;  %v1456_v9 = vld [vmem:[#allocation5 + $0x2c8] sm:$0xf0]  ;;  %v1395_v63 = vor.u32 %v1561_v59, %v1392_v8  ;;  %v1379_v27 = vor.u32 %v1557_v21, %v1376_v22  ;;  %p1767_p5 = pneg %p1766_p3 }
  0x77   : > { %969 = vmatpush.bf16.msra.mxu3 %v1483_v31  ;;  %v1459_v3 = vor.u32 %v1577_v60, %v1456_v9  ;;  %v1443_v31 = vor.u32 %v1573_v23, %v1440_v24 }
  0x78   : > { %931 = vmatpush.bf16.msra.mxu0 %v1283_v38  ;;  %v1243_v38 = vor.u32 %v1523_v28, %v1240_v29  ;;  %p1772_p9 = pnand %p1771_p8, %p1767_p5 }
  0x79   : > { %944 = vmatpush.bf16.msra.mxu1 %v1347_v40  ;;  %v1307_v40 = vor.u32 %v1539_v30, %v1304_v32 }
  0x7a   : > { %957 = vmatpush.bf16.msra.mxu2 %v1411_v41  ;;  %v1371_v41 = vor.u32 %v1555_v33, %v1368_v34 }
  0x7b   : > { %970 = vmatpush.bf16.msra.mxu3 %v1475_v45  ;;  %v1435_v45 = vor.u32 %v1571_v36, %v1432_v37 }
  0x7c   : > { %932 = vmatpush.bf16.msra.mxu0 %v1275_v51  ;;  %v1235_v51 = vor.u32 %v1521_v42, %v1232_v43 }
  0x7d   : > { %945 = vmatpush.bf16.msra.mxu1 %v1339_v52  ;;  %v1299_v52 = vor.u32 %v1537_v44, %v1296_v46 }
  0x7e   : > { %958 = vmatpush.bf16.msra.mxu2 %v1403_v53  ;;  %v1363_v53 = vor.u32 %v1553_v47, %v1360_v48 }
  0x7f   : > { %971 = vmatpush.bf16.msra.mxu3 %v1467_v57  ;;  %v319_v57 = vld [vmem:[#allocation7] sm:$0x3] }
  0x80   : > { %933 = vmatpush.bf16.msra.mxu0 %v1267_v61  ;;  %v321_v58 = vperm.slane %v319_v57, 0 }
  0x81   : > { %946 = vmatpush.bf16.msra.mxu1 %v1331_v62 }
  0x82   : > { %959 = vmatpush.bf16.msra.mxu2 %v1395_v63 }
  0x83   : > { %972 = vmatpush.bf16.msra.mxu3 %v1459_v3 }
  0x84   : > { %934 = vmatpush.bf16.msra.mxu0 %v1259_v11  ;;  %v322_v11 = vperm.slane %v319_v57, 1 }
  0x85   : > { %947 = vmatpush.bf16.msra.mxu1 %v1323_v12 }
  0x86   : > { %960 = vmatpush.bf16.msra.mxu2 %v1387_v13 }
  0x87   : > { %973 = vmatpush.bf16.msra.mxu3 %v1451_v19 }
  0x88   : > { %935 = vmatpush.bf16.msra.mxu0 %v1251_v25 }
  0x89   : > { %948 = vmatpush.bf16.msra.mxu1 %v1315_v26 }
  0x8a   : > { %961 = vmatpush.bf16.msra.mxu2 %v1379_v27 }
  0x8b   : > { %974 = vmatpush.bf16.msra.mxu3 %v1443_v31 }
  0x8c   : > { %936 = vmatpush.bf16.msra.mxu0 %v1243_v38 }
  0x8d   : > { %949 = vmatpush.bf16.msra.mxu1 %v1307_v40 }
  0x8e   : > { %962 = vmatpush.bf16.msra.mxu2 %v1371_v41 }
  0x8f   : > { %975 = vmatpush.bf16.msra.mxu3 %v1435_v45 }
  0x90   : > { %937 = vmatpush.bf16.msra.mxu0 %v1235_v51 }
  0x91   : > { %950 = vmatpush.bf16.msra.mxu1 %v1299_v52 }
  0x92   : > { %963 = vmatpush.bf16.msra.mxu2 %v1363_v53 }
  0x93   : > { %976 = vmatpush.bf16.msra.mxu3 %v1427_v54  ;;  %938 = vmatmul.bf16.vlgmr.msra.gmra.mxu0 %v1958_v14 }
  0x94   : > { %951 = vmatmul.bf16.vlgmr.msra.gmra.mxu1 %v1960_v15 }
  0x95   : > { %964 = vmatmul.bf16.vlgmr.msra.gmra.mxu2 %v1967_v35 }
  0x96   : > { %977 = vmatmul.bf16.vlgmr.msra.gmra.mxu3 %v1969_v39 }
  0xd0   : > { %v835_v55 = vpop.f32.mrf.mxu0 }
  0xd1   : > { %v848_v56 = vpop.f32.mrf.mxu1  ;;  %v836_v61 = vadd.f32 %v835_v55, %v321_v58 }
  0xd3   : > { %v849_v62 = vadd.f32 %v848_v56, %v836_v61 }
  0xd8   : > { %v861_v59 = vpop.f32.mrf.mxu2  ;;  %v837_v60 = vpop.f32.mrf.mxu0 }
  0xd9   : > { %v874_v8 = vpop.f32.mrf.mxu3  ;;  %v850_v9 = vpop.f32.mrf.mxu1  ;;  %v862_v14 = vadd.f32 %v861_v59, %v849_v62 }
  0xdb   : > { %v875_v1 = vadd.f32 %v874_v8, %v862_v14 }
  0xe0   : > { %v863_v63 = vpop.f32.mrf.mxu2 }
  0xe1   : > { %v876_v0 = vpop.f32.mrf.mxu3 }
  0xf0   : > { %v887_v15 = vpop.f32.mrf.mxu0 }
  0xf1   : > { %v888_v35 = vadd.f32 %v887_v15, %v875_v1  ;;  %v900_v2 = vpop.f32.mrf.mxu1 }
  0xf3   : > { %v901_v39 = vadd.f32 %v900_v2, %v888_v35 }
  0xf5   : > { %982 = vst [vmem:[%s219_s8] sm:$0xff] %v901_v39 }
  0xf8   : > { %v913_v3 = vpop.f32.mrf.mxu2  ;;  %v889_v5 = vpop.f32.mrf.mxu0 }
  0xf9   : > { %v926_v4 = vpop.f32.mrf.mxu3  ;;  %v902_v6 = vpop.f32.mrf.mxu1  ;;  %v914_v12 = vadd.f32 %v913_v3, %v322_v11 }
  0xfb   : > { %v927_v13 = vadd.f32 %v926_v4, %v914_v12 }
 0x100   : > { %v915_v7 = vpop.f32.mrf.mxu2 }
 0x101   : > { %v928_v10 = vpop.f32.mrf.mxu3 }
 0x110   : > { %v939_v16 = vpop.f32.mrf.mxu0 }
 0x111   : > { %v952_v17 = vpop.f32.mrf.mxu1  ;;  %v940_v18 = vadd.f32 %v939_v16, %v927_v13 }
 0x113   : > { %v953_v19 = vadd.f32 %v952_v17, %v940_v18 }
 0x118   : > { %v965_v20 = vpop.f32.mrf.mxu2  ;;  %v941_v23 = vpop.f32.mrf.mxu0 }
 0x119   : > { %v966_v21 = vadd.f32 %v965_v20, %v953_v19  ;;  %v978_v22 = vpop.f32.mrf.mxu3  ;;  %v954_v24 = vpop.f32.mrf.mxu1 }
 0x11b   : > { %v979_v25 = vadd.f32 %v978_v22, %v966_v21 }
 0x11d   : > { %983 = vst [vmem:[%s219_s8 + $0x8] sm:$0xff] %v979_v25 }
 0x11e   : > { %1775 = shalt.err (!%p1772_p9)
}
 0x11f   : > { %1599 = dma.vmem_to_hbm [thread:$0]  (%p1909_p4), %s999_s27, 256, %s1001_s28, %s985_s29  }
 0x120   : > { %v967_v26 = vpop.f32.mrf.mxu2 }
 0x121   : > { %v980_v27 = vpop.f32.mrf.mxu3 }
 0x122 PF: > { %s1012_s9 = sand.u32 1, %s1806_s12   ;;  %p2022_p10 = scmp.ge.s32.totalorder %s1818_s15, 2 }
 0x123   : > { %s1013_s22 = scalar_lea.sflag [#allocation4], %s1012_s9 }
 0x124   : > { %p1613_p11 = pnand %p2022_p10, %p1913_p6 }
 0x126   : > { %p1614_p13 = pneg %p1613_p11 }
 0x128   : > { %1801 = dma.done.wait (%p1614_p13), %s1013_s22, 256  }
 0x129   : > { %1803 = vsyncadd (%p1614_p13), %s1013_s22, 4294967040  ;;  %p17_p4 = scmp.ge.s32.totalorder %s1887_s4, 4   ;;  %s2023_s12 = smov %s1810_s13 }
 0x12a   : > { %s2024_s13 = smov %s1814_s14  ;;  %s2025_s14 = smov %s1898_s7 }
 0x12b   : > { %s2026_s15 = smov %s1887_s4  ;;  %19 = sbr.rel (!%p17_p4) target bundleno = 6 (0x6), region = 85 }
 0x130   :  { %1019 = vsyncpa [#allocation3], 1 }
 0x131   :  { %1021 = vsyncpa [#allocation3 + $0x1], 1 }
 0x132   :  { %1022 = vsyncpa [#allocation6], 1 }
 0x133   :  { %1023 = vsyncpa [#allocation4], 1 }
 0x134   :  { %1025 = vsyncpa [#allocation4 + $0x1], 1 }

</bundles_post_ra>
